<compile_context>
chip_gen: v7x
topology: tpu7x:2x2x1
jax: 0.10.0
libtpu: 0.0.40
codegen_flags: <defaults>
</compile_context>

<pallas_src>
import jax
import jax.numpy as jnp
from jax.experimental import pallas as pl
from jax.experimental.pallas import tpu as pltpu


def _round_up(x, m):
    return (x + m - 1) // m * m


def _cdiv(a, b):
    return (a + b - 1) // b


def qnet_kernel(xu_ref, *refs):
    """One batch tile.  Activations are feature-major: [features, TB].

    refs = w0, b0, w1, b1, ..., w_out(col), b_out, out_ref.
    Hidden layers run on the MXU; the final Linear(H, 1) is a VPU multiply +
    sublane reduction so the result stays a lane-dense (1, TB) row.
    """
    f32 = jnp.float32
    *layer_refs, out_ref = refs
    n_hidden = len(layer_refs) // 2 - 1

    h = xu_ref[...].astype(f32)                                   # (D, TB)
    for l in range(n_hidden):
        w = layer_refs[2 * l][...]                                # (Hl, prev)
        b = layer_refs[2 * l + 1][...]                            # (Hl, 1)
        h = jnp.dot(w, h, preferred_element_type=f32)
        h = jnp.maximum(h + b, 0.0)                               # (Hl, TB)

    w_out = layer_refs[-2][...]                                   # (H_last, 1)
    b_out = layer_refs[-1][...]                                   # (1, 1)
    q = jnp.sum(w_out * h, axis=0, keepdims=True) + b_out         # (1, TB)
    out_ref[...] = q.astype(out_ref.dtype)


def qnet_forward_feature_major(xu_t, params, *, tb_max=4096,
                               out_dtype=jnp.float32):
    """xu_t: feature-major [input_dim + output_dim, B] (already concatenated /
    cast by the caller).  Returns the lane-dense Q row [1, B]."""
    assert tb_max % 128 == 0, "tb_max must be a multiple of 128"
    d_total, b = xu_t.shape

    # ---- batch-tile selection -------------------------------------------
    b128 = _round_up(max(b, 1), 128)          # lane-dense output stores
    if b128 < 512:
        tb = b128                             # tiny batch: one tile
    else:
        # >= 2 tiles so both v7x TensorCores get work; cap at tb_max so the
        # ~600-cycle per-step overhead is amortized on big batches, and size
        # the tile to minimize tail padding for mid-sized batches.
        n_tiles = max(2, _cdiv(b128, tb_max))
        tb = _round_up(_cdiv(b128, n_tiles), 128)
    b_pad = _round_up(b128, tb)
    if b_pad != b:
        xu_t = jnp.pad(xu_t, ((0, 0), (0, b_pad - b)))
    grid = (b_pad // tb,)

    # ---- weights / biases (PyTorch layout W:[out,in], b:[out]) -----------
    def const_spec(shape):
        # Constant index_map -> block stays VMEM-resident across grid steps.
        return pl.BlockSpec(shape, lambda i: (0, 0))

    flat_args, flat_specs = [], []
    for w, bias in params[:-1]:
        wf = jnp.asarray(w, jnp.float32)
        bc = jnp.asarray(bias, jnp.float32).reshape(-1, 1)
        flat_args += [wf, bc]
        flat_specs += [const_spec(wf.shape), const_spec(bc.shape)]
    w_last, b_last = params[-1]
    w_last_c = jnp.asarray(w_last, jnp.float32).reshape(-1, 1)     # (H_last, 1)
    b_last_c = jnp.asarray(b_last, jnp.float32).reshape(1, 1)      # (1, 1)
    flat_args += [w_last_c, b_last_c]
    flat_specs += [const_spec(w_last_c.shape), const_spec(b_last_c.shape)]

    q_rows = pl.pallas_call(
        qnet_kernel,
        out_shape=jax.ShapeDtypeStruct((1, b_pad), out_dtype),
        grid=grid,
        in_specs=[pl.BlockSpec((d_total, tb), lambda i: (0, i))] + flat_specs,
        out_specs=pl.BlockSpec((1, tb), lambda i: (0, i)),
        compiler_params=pltpu.CompilerParams(
            dimension_semantics=("parallel",)),
    )(xu_t, *flat_args)

    return q_rows[:, :b]


def qnet_forward(state, action, params, *, tb_max=4096,
                 input_dtype=jnp.bfloat16):
    """PyTorch-shaped entry point: state [B, ds], action [B, da] -> Q [B, 1]."""
    # Mirror QNet._format's unsqueeze for unbatched inputs.
    state = jnp.atleast_2d(jnp.asarray(state, jnp.float32))
    action = jnp.atleast_2d(jnp.asarray(action, jnp.float32))
    B = state.shape[0]
    # Fuse torch.cat((state, action), dim=1), cast the HBM-dominant activation
    # stream to bf16 (accumulation stays f32 in-kernel) and go feature-major.
    # If the producer (e.g. replay buffer) can store (D, B) batches directly,
    # call qnet_forward_feature_major and skip this transpose entirely.
    xu_t = jnp.concatenate([state, action], axis=1).astype(input_dtype).T
    q = qnet_forward_feature_major(xu_t, params, tb_max=tb_max)
    return q.reshape(B, 1)   # back to the PyTorch (B, 1) convention


def init_qnet_params(key, input_dim, output_dim, hidden_dims=(32, 32)):
    """nn.Linear-style init (uniform +-1/sqrt(fan_in)), PyTorch layouts:
    W: [out_features, in_features], b: [out_features]."""
    dims = [input_dim + output_dim, *hidden_dims, 1]
    params = []
    for i in range(len(dims) - 1):
        fan_in, fan_out = dims[i], dims[i + 1]
        key, kw, kb = jax.random.split(key, 3)
        bound = 1.0 / (fan_in ** 0.5)
        w = jax.random.uniform(kw, (fan_out, fan_in), jnp.float32, -bound, bound)
        b = jax.random.uniform(kb, (fan_out,), jnp.float32, -bound, bound)
        params.append((w, b))
    return params


def qnet_reference(state, action, params, input_dtype=jnp.float32):
    """Pure-JAX mirror of the PyTorch forward (concat -> Linear/ReLU stack),
    with the same input quantization as the kernel path."""
    x = jnp.concatenate([state, action], axis=1)
    x = x.astype(input_dtype).astype(jnp.float32)
    for w, b in params[:-1]:
        x = jnp.maximum(x @ w.T + b, 0.0)
    w, b = params[-1]
    return x @ w.T + b


if __name__ == "__main__":
    key = jax.random.PRNGKey(0)
    k_params, k_data = jax.random.split(key)

    input_dim = 16    # state dim
    output_dim = 4    # action dim
    hidden_dims = (32, 32)
    params = init_qnet_params(k_params, input_dim, output_dim, hidden_dims)

    fwd = jax.jit(qnet_forward, static_argnames=("tb_max", "input_dtype"))

    # Small single-tile batch (both bf16 and f32 activation paths), plus a
    # multi-tile batch exercising the grid split (1000 rows -> two 512 tiles)
    # and the tail-padding path.
    cases = ((2, jnp.bfloat16), (2, jnp.float32), (1000, jnp.bfloat16))
    for batch, in_dtype in cases:
        ks, ka = jax.random.split(jax.random.fold_in(k_data, batch))
        state = jax.random.normal(ks, (batch, input_dim), jnp.float32)
        action = jax.random.normal(ka, (batch, output_dim), jnp.float32)

        q = jax.block_until_ready(fwd(state, action, params, input_dtype=in_dtype))
        q_ref = qnet_reference(state, action, params, input_dtype=in_dtype)

        assert q.shape == (batch, 1), q.shape
        err = float(jnp.max(jnp.abs(q - q_ref)))
        # Reference applies the same input quantization, so the remaining gap
        # is only TPU's default reduced-precision f32 matmul passes; genuine
        # structural bugs produce errors orders of magnitude larger.
        assert err < 1e-2, f"batch={batch} dtype={in_dtype} max_abs_err={err}"

    print("KERNEL_OK")
</pallas_src>

<mosaic_0001>
module attributes {stable_mosaic.version = 11 : i64} {
  func.func @qnet_kernel(%arg0: i32, %arg1: memref<20x128xbf16, #tpu.memory_space<vmem>>, %arg2: memref<32x20xf32, #tpu.memory_space<vmem>>, %arg3: memref<32x1xf32, #tpu.memory_space<vmem>>, %arg4: memref<32x32xf32, #tpu.memory_space<vmem>>, %arg5: memref<32x1xf32, #tpu.memory_space<vmem>>, %arg6: memref<32x1xf32, #tpu.memory_space<vmem>>, %arg7: memref<1x1xf32, #tpu.memory_space<vmem>>, %arg8: memref<1x128xf32, #tpu.memory_space<vmem>>) attributes {dimension_semantics = [#tpu.dimension_semantics<parallel>], iteration_bounds = array<i64: 1>, scalar_prefetch = 0 : i64, scratch_operands = 0 : i64, tpu.core_type = #tpu.core_type<tc>, window_params = [{transform_indices = @transform_0, window_bounds = array<i64: 20, 128>}, {pipeline_mode = #tpu.pipeline_mode<synchronous>, transform_indices = @transform_1, window_bounds = array<i64: 32, 20>}, {pipeline_mode = #tpu.pipeline_mode<synchronous>, transform_indices = @transform_2, window_bounds = array<i64: 32, 1>}, {pipeline_mode = #tpu.pipeline_mode<synchronous>, transform_indices = @transform_3, window_bounds = array<i64: 32, 32>}, {pipeline_mode = #tpu.pipeline_mode<synchronous>, transform_indices = @transform_4, window_bounds = array<i64: 32, 1>}, {pipeline_mode = #tpu.pipeline_mode<synchronous>, transform_indices = @transform_5, window_bounds = array<i64: 32, 1>}, {pipeline_mode = #tpu.pipeline_mode<synchronous>, transform_indices = @transform_6, window_bounds = array<i64: 1, 1>}, {transform_indices = @transform_7, window_bounds = array<i64: 1, 128>}]} {
    %c0 = arith.constant 0 : index
    %c0_0 = arith.constant 0 : index
    %0 = vector.load %arg1[%c0, %c0_0] : memref<20x128xbf16, #tpu.memory_space<vmem>>, vector<20x128xbf16>
    %1 = arith.extf %0 : vector<20x128xbf16> to vector<20x128xf32>
    %c0_1 = arith.constant 0 : index
    %c0_2 = arith.constant 0 : index
    %2 = vector.load %arg2[%c0_1, %c0_2] : memref<32x20xf32, #tpu.memory_space<vmem>>, vector<32x20xf32>
    %c0_3 = arith.constant 0 : index
    %c0_4 = arith.constant 0 : index
    %3 = vector.load %arg3[%c0_3, %c0_4] : memref<32x1xf32, #tpu.memory_space<vmem>>, vector<32x1xf32>
    %cst = arith.constant dense<0.000000e+00> : vector<32x128xf32>
    %4 = tpu.matmul %2, %1, %cst {dimension_numbers = #tpu.dot_dimension_numbers<[1], [0], [0], [1], [0, 0, 1, 1], [], []>} : vector<32x20xf32>, vector<20x128xf32>, vector<32x128xf32> -> vector<32x128xf32>
    %5 = vector.broadcast %3 : vector<32x1xf32> to vector<32x128xf32>
    %6 = arith.addf %4, %5 : vector<32x128xf32>
    %cst_5 = arith.constant 0.000000e+00 : f32
    %7 = vector.broadcast %cst_5 : f32 to vector<32x128xf32>
    %8 = arith.maximumf %6, %7 : vector<32x128xf32>
    %c0_6 = arith.constant 0 : index
    %c0_7 = arith.constant 0 : index
    %9 = vector.load %arg4[%c0_6, %c0_7] : memref<32x32xf32, #tpu.memory_space<vmem>>, vector<32x32xf32>
    %c0_8 = arith.constant 0 : index
    %c0_9 = arith.constant 0 : index
    %10 = vector.load %arg5[%c0_8, %c0_9] : memref<32x1xf32, #tpu.memory_space<vmem>>, vector<32x1xf32>
    %cst_10 = arith.constant dense<0.000000e+00> : vector<32x128xf32>
    %11 = tpu.matmul %9, %8, %cst_10 {dimension_numbers = #tpu.dot_dimension_numbers<[1], [0], [0], [1], [0, 0, 1, 1], [], []>} : vector<32x32xf32>, vector<32x128xf32>, vector<32x128xf32> -> vector<32x128xf32>
    %12 = vector.broadcast %10 : vector<32x1xf32> to vector<32x128xf32>
    %13 = arith.addf %11, %12 : vector<32x128xf32>
    %cst_11 = arith.constant 0.000000e+00 : f32
    %14 = vector.broadcast %cst_11 : f32 to vector<32x128xf32>
    %15 = arith.maximumf %13, %14 : vector<32x128xf32>
    %c0_12 = arith.constant 0 : index
    %c0_13 = arith.constant 0 : index
    %16 = vector.load %arg6[%c0_12, %c0_13] : memref<32x1xf32, #tpu.memory_space<vmem>>, vector<32x1xf32>
    %c0_14 = arith.constant 0 : index
    %c0_15 = arith.constant 0 : index
    %17 = vector.load %arg7[%c0_14, %c0_15] : memref<1x1xf32, #tpu.memory_space<vmem>>, vector<1x1xf32>
    %18 = vector.broadcast %16 : vector<32x1xf32> to vector<32x128xf32>
    %19 = arith.mulf %18, %15 : vector<32x128xf32>
    %cst_16 = arith.constant dense<0.000000e+00> : vector<128xf32>
    %20 = vector.multi_reduction <add>, %19, %cst_16 [0] : vector<32x128xf32> to vector<128xf32>
    %21 = vector.shape_cast %20 : vector<128xf32> to vector<1x128xf32>
    %22 = vector.broadcast %17 : vector<1x1xf32> to vector<1x128xf32>
    %23 = arith.addf %21, %22 : vector<1x128xf32>
    %c0_17 = arith.constant 0 : index
    %c0_18 = arith.constant 0 : index
    %24 = vector.load %arg8[%c0_17, %c0_18] : memref<1x128xf32, #tpu.memory_space<vmem>>, vector<1x128xf32>
    tpu.vector_store %arg8[%c0_17, %c0_18], %23 {strides = array<i32>} : memref<1x128xf32, #tpu.memory_space<vmem>>, vector<1x128xf32>,
    return
  }
  func.func @transform_0(%arg0: i32) -> (i32, i32) {
    %c0_i32 = arith.constant 0 : i32
    %c0_i32_0 = arith.constant 0 : i32
    return %c0_i32, %arg0 : i32, i32
  }
  func.func @transform_1(%arg0: i32) -> (i32, i32) {
    %c0_i32 = arith.constant 0 : i32
    %c0_i32_0 = arith.constant 0 : i32
    %c0_i32_1 = arith.constant 0 : i32
    return %c0_i32, %c0_i32_0 : i32, i32
  }
  func.func @transform_2(%arg0: i32) -> (i32, i32) {
    %c0_i32 = arith.constant 0 : i32
    %c0_i32_0 = arith.constant 0 : i32
    %c0_i32_1 = arith.constant 0 : i32
    return %c0_i32, %c0_i32_0 : i32, i32
  }
  func.func @transform_3(%arg0: i32) -> (i32, i32) {
    %c0_i32 = arith.constant 0 : i32
    %c0_i32_0 = arith.constant 0 : i32
    %c0_i32_1 = arith.constant 0 : i32
    return %c0_i32, %c0_i32_0 : i32, i32
  }
  func.func @transform_4(%arg0: i32) -> (i32, i32) {
    %c0_i32 = arith.constant 0 : i32
    %c0_i32_0 = arith.constant 0 : i32
    %c0_i32_1 = arith.constant 0 : i32
    return %c0_i32, %c0_i32_0 : i32, i32
  }
  func.func @transform_5(%arg0: i32) -> (i32, i32) {
    %c0_i32 = arith.constant 0 : i32
    %c0_i32_0 = arith.constant 0 : i32
    %c0_i32_1 = arith.constant 0 : i32
    return %c0_i32, %c0_i32_0 : i32, i32
  }
  func.func @transform_6(%arg0: i32) -> (i32, i32) {
    %c0_i32 = arith.constant 0 : i32
    %c0_i32_0 = arith.constant 0 : i32
    %c0_i32_1 = arith.constant 0 : i32
    return %c0_i32, %c0_i32_0 : i32, i32
  }
  func.func @transform_7(%arg0: i32) -> (i32, i32) {
    %c0_i32 = arith.constant 0 : i32
    %c0_i32_0 = arith.constant 0 : i32
    return %c0_i32, %arg0 : i32, i32
  }
}

</mosaic_0001>

<bundles_post_ra>
// kernel: qnet_forward.1
= control target key start
LH: loop header
LB: loop body
LE: loop exit
PB: predicated region body
PF: predicated region fallthrough
CT: control target
= control target key end

     0   :  { %vm62_vm0 = vcmask 162816   ;;  %vm75_vm1 = vcmask 1043456   ;;  %v420_v3 = vmov 0   ;;  %vm196_vm2 = vcmask 261120   ;;  %s543_s0 = inlined_call_operand.vmem [shape: bf16[20,128], index: 0, kind: input, shape index: {}]   ;;  %s544_s1 = inlined_call_operand.vmem [shape: f32[32,20], index: 1, kind: input, shape index: {}]   ;;  %s545_s2 = inlined_call_operand.vmem [shape: f32[32,1], index: 2, kind: input, shape index: {}]   ;;  %s546_s6 = inlined_call_operand.<no memory space> [shape: f32[1,1], index: 6, kind: input, shape index: {}]   ;;  %s547_s4 = inlined_call_operand.vmem [shape: f32[32,1], index: 4, kind: input, shape index: {}]   ;;  %s548_s5 = inlined_call_operand.vmem [shape: f32[32,1], index: 5, kind: input, shape index: {}]   ;;  %s549_s3 = inlined_call_operand.vmem [shape: f32[32,32], index: 3, kind: input, shape index: {}]   ;;  %s550_s7 = inlined_call_operand.vmem [shape: f32[1,128], index: 7, kind: output, shape index: {}]  }
   0x1   :  { %v361_v0 = vld [vmem:[%s543_s0] sm:$0xff]   ;;  %v30_v1 = vld [vmem:[%s543_s0 + $0x8] sm:$0x3]  ;;  %418 = vset.pattern.permute.xlu0 %v420_v3  ;;  %419 = vset.pattern.permute.xlu1 %v420_v3  ;;  %v12_v4 = vstv %s546_s6  ;;  %v40_v7 = vld [vmem:[%s545_s2 + $0x10] sm:$0xff] }
   0x2   :  { %v34_v2 = vld [vmem:[%s544_s1] sm:$0xff]  ;;  %v33_v5 = vunpack.c.l.bf16 %v30_v1  ;;  %406 = vmatprep.subr.bf16.mxu0 %v361_v0  ;;  %13 = vst [vmem:[#allocation2] sm:$0x1] %v12_v4  ;;  %v35_v8 = vld [vmem:[%s544_s1 + $0x8] sm:$0xff]  ;;  %54 = vperm.xlu1 %419, %v40_v7   ;;  %v36_v10 = vld [vmem:[%s544_s1 + $0x10] sm:$0xff] }
   0x3   :  { %385 = vmatprep.mubr.msk.f32.mxu0 %vm62_vm0, %v34_v2  ;;  %408 = vmatpush3.bf16.msra.mxu0 %v361_v0  ;;  %v38_v6 = vld [vmem:[%s545_s2] sm:$0xff]  ;;  %v39_v9 = vld [vmem:[%s545_s2 + $0x8] sm:$0xff]  ;;  %v41_v11 = vld [vmem:[%s545_s2 + $0x18] sm:$0xff] }
   0x4   :  { %383 = vmatprep.subr.msk.mxu0 %vm75_vm1, %v33_v5  ;;  %44 = vperm.xlu0 %418, %v38_v6   ;;  %v37_v12 = vld [vmem:[%s544_s1 + $0x18] sm:$0xff]  ;;  %v172_v13 = vld [vmem:[%s547_s4] sm:$0xff]  ;;  %v173_v14 = vld [vmem:[%s547_s4 + $0x8] sm:$0xff]  ;;  %v341_v6 = vlaneseq }
   0x5   :  { %v174_v15 = vld [vmem:[%s547_s4 + $0x10] sm:$0xff]  ;;  %v175_v16 = vld [vmem:[%s547_s4 + $0x18] sm:$0xff]  ;;  %v298_v17 = vld [vmem:[%s548_s5] sm:$0xff] }
   0x6   :  { %59 = vperm.xlu1 %419, %v41_v11   ;;  %v299_v18 = vld [vmem:[%s548_s5 + $0x8] sm:$0xff]  ;;  %v300_v19 = vld [vmem:[%s548_s5 + $0x10] sm:$0xff]  ;;  %v301_v20 = vld [vmem:[%s548_s5 + $0x18] sm:$0xff] }
   0x7   :  { %384 = vmatpush3.msk.msra.mxu0 %vm75_vm1, %v33_v5  ;;  %v168_v22 = vld [vmem:[%s549_s3] sm:$0xff]  ;;  %v169_v41 = vld [vmem:[%s549_s3 + $0x8] sm:$0xff]  ;;  %v170_v42 = vld [vmem:[%s549_s3 + $0x10] sm:$0xff] }
   0x8   :  { %386 = vmatmul.mubr.msk.f32.vlgmr.msra.gmra.mrb[0].mxu0 %vm62_vm0, %v35_v8  ;;  %49 = vperm.xlu0 %418, %v39_v9   ;;  %v171_v43 = vld [vmem:[%s549_s3 + $0x18] sm:$0xff]  ;;  %v342_v9 = vshrl.u32 %v341_v6, 7 }
   0x9   :  { %388 = vmatprep.mubr.msk.f32.mxu0 %vm62_vm0, %v36_v10  ;;  %v302_v21 = vld [vmem:[#allocation2] sm:$0x1]  ;;  %399 = vmatprep.mubr.msk.f32.mxu1 %vm196_vm2, %v168_v22 }
   0xa   :  { %183 = vperm.xlu1 %419, %v173_v14  }
   0xc   :  { %389 = vmatmul.mubr.msk.f32.gmra.mrb[2].mxu0 %vm62_vm0, %v37_v12  ;;  %178 = vperm.xlu0 %418, %v172_v13   ;;  %v343_v12 = vsub.s32 0, %v342_v9 }
   0xe   :  { %193 = vperm.xlu1 %419, %v175_v16  }
  0x10   :  { %188 = vperm.xlu0 %418, %v174_v15  }
  0x12   :  { %310 = vperm.xlu1 %419, %v299_v18  }
  0x14   :  { %305 = vperm.xlu0 %418, %v298_v17  }
  0x16   :  { %320 = vperm.xlu1 %419, %v301_v20  }
  0x18   :  { %315 = vperm.xlu0 %418, %v300_v19  }
  0x1c   :  { %338 = vperm.xlu0 %418, %v302_v21  }
  0x81   :  { %v55_v24 = vpop.permute.xlu1 %54 }
  0x83   :  { %v45_v23 = vpop.permute.xlu0 %44 }
  0x85   :  { %v60_v31 = vpop.permute.xlu1 %59 }
  0x87   :  { %v50_v25 = vpop.permute.xlu0 %49 }
  0x89   :  { %v184_v45 = vpop.permute.xlu1 %183 }
  0x8b   :  { %v179_v44 = vpop.permute.xlu0 %178 }
  0x8d   :  { %v194_v47 = vpop.permute.xlu1 %193 }
  0x8f   :  { %v189_v46 = vpop.permute.xlu0 %188 }
  0x91   :  { %v311_v54 = vpop.permute.xlu1 %310 }
  0x93   :  { %v306_v52 = vpop.permute.xlu0 %305 }
  0x95   :  { %v321_v3 = vpop.permute.xlu1 %320 }
  0x97   :  { %v316_v1 = vpop.permute.xlu0 %315 }
  0x9b   :  { %v339_v14 = vpop.permute.xlu0 %338 }
  0x9c   :  { %v344_v16 = vrot.slane %v339_v14, %v343_v12 }
  0xdb   :  { %v387_v26 = vpop.f32.mrb[0].mxu0 }
  0xdc   :  { %v151_v27 = vadd.f32 %v387_v26, %v50_v25  ;;  %v145_v28 = vpop.f32.mrb[1].mxu0 }
  0xdd   :  { %v146_v29 = vadd.f32 %v145_v28, %v45_v23 }
  0xde   :  { %v165_v30 = vmax.f32 %v151_v27, 0.0 }
  0xdf   :  { %v164_v32 = vmax.f32 %v146_v29, 0.0  ;;  %v390_v33 = vpop.f32.mrb[2].mxu0 }
  0xe0   :  { %v161_v34 = vadd.f32 %v390_v33, %v60_v31  ;;  %v155_v35 = vpop.f32.mrb[3].mxu0 }
  0xe1   :  { %v156_v36 = vadd.f32 %v155_v35, %v55_v24  ;;  %v409_v37 = vpack.c.bf16 %v165_v30, %v164_v32 }
  0xe2   :  { %v167_v38 = vmax.f32 %v161_v34, 0.0 }
  0xe3   :  { %v166_v39 = vmax.f32 %v156_v36, 0.0  ;;  %410 = vmatprep.subr.bf16.mxu1 %v409_v37 }
  0xe4   :  { %412 = vmatpush3.bf16.msra.mxu1 %v409_v37 }
  0xe5   :  { %v413_v40 = vpack.c.bf16 %v167_v38, %v166_v39 }
  0xe7   :  { %414 = vmatprep.subr.bf16.mxu1 %v413_v40 }
  0xe8   :  { %416 = vmatpush3.bf16.msra.mxu1 %v413_v40 }
  0xeb   :  { %400 = vmatmul.mubr.msk.f32.vlgmr.msra.gmra.mrb[0].mxu1 %vm196_vm2, %v169_v41 }
  0xec   :  { %402 = vmatprep.mubr.msk.f32.mxu1 %vm196_vm2, %v170_v42 }
  0xef   :  { %403 = vmatmul.mubr.msk.f32.gmra.mrb[2].mxu1 %vm196_vm2, %v171_v43 }
 0x1be   :  { %v401_v48 = vpop.f32.mrb[0].mxu1 }
 0x1bf   :  { %v281_v49 = vadd.f32 %v401_v48, %v184_v45  ;;  %v275_v50 = vpop.f32.mrb[1].mxu1 }
 0x1c0   :  { %v276_v51 = vadd.f32 %v275_v50, %v179_v44 }
 0x1c1   :  { %v295_v53 = vmax.f32 %v281_v49, 0.0 }
 0x1c2   :  { %v294_v55 = vmax.f32 %v276_v51, 0.0  ;;  %v404_v56 = vpop.f32.mrb[2].mxu1 }
 0x1c3   :  { %v324_v57 = vmul.f32 %v311_v54, %v295_v53  ;;  %v291_v58 = vadd.f32 %v404_v56, %v194_v47  ;;  %v285_v59 = vpop.f32.mrb[3].mxu1 }
 0x1c4   :  { %v323_v60 = vmul.f32 %v306_v52, %v294_v55  ;;  %v286_v61 = vadd.f32 %v285_v59, %v189_v46 }
 0x1c5   :  { %v297_v63 = vmax.f32 %v291_v58, 0.0 }
 0x1c6   :  { %v327_v62 = vadd.f32 %v324_v57, %v323_v60  ;;  %v296_v0 = vmax.f32 %v286_v61, 0.0 }
 0x1c7   :  { %v326_v4 = vmul.f32 %v321_v3, %v297_v63 }
 0x1c8   :  { %v325_v2 = vmul.f32 %v316_v1, %v296_v0 }
 0x1ca   :  { %v328_v5 = vadd.f32 %v327_v62, %v325_v2 }
 0x1cc   :  { %v329_v7 = vadd.f32 %v328_v5, %v326_v4 }
 0x1ce   :  { %v330_v8 = vrot.slane %v329_v7, 4 }
 0x1d0   :  { %v331_v10 = vadd.f32 %v330_v8, %v329_v7 }
 0x1d2   :  { %v332_v11 = vrot.slane %v331_v10, 2 }
 0x1d4   :  { %v333_v13 = vadd.f32 %v332_v11, %v331_v10 }
 0x1d6   :  { %v334_v15 = vrot.slane %v333_v13, 1 }
 0x1d8   :  { %v335_v17 = vadd.f32 %v334_v15, %v333_v13 }
 0x1da   :  { %v345_v18 = vadd.f32 %v344_v16, %v335_v17 }
 0x1dc   :  { %346 = vst [vmem:[%s550_s7] sm:$0x1] %v345_v18 }

</bundles_post_ra>
